<compile_context>
chip_gen: v5e
topology: v5e:2x2
jax: 0.10.0
libtpu: 0.0.40
codegen_flags: <defaults>
</compile_context>

<pallas_src>
import functools
from math import factorial, pi, sqrt

import numpy as np
import jax
import jax.numpy as jnp
from jax.experimental import pallas as pl
from jax.experimental.pallas import tpu as pltpu


# ----------------------------------------------------------------------------
# Deterministic construction of the Phi_quad buffer (host-side numpy "glue",
# mirrors dipy's real_sym_sh_basis used in the module's __init__).
# ----------------------------------------------------------------------------
def cart2sphere(x):
    r = np.sqrt(x[:, 0] ** 2 + x[:, 1] ** 2 + x[:, 2] ** 2)
    theta = np.arctan2(x[:, 1], x[:, 0])
    phi = np.arccos(np.clip(x[:, 2] / r, -1.0, 1.0))
    return np.column_stack([theta, phi]).astype(np.float32)


def sph_harm_ind_list(sh_order):
    if sh_order % 2 != 0:
        raise ValueError("sh_order must be an even integer >= 0")
    n_range = np.arange(0, sh_order + 1, 2, dtype=int)
    ncoef = int((sh_order + 2) * (sh_order + 1) // 2)
    n_list = np.repeat(n_range, n_range * 2 + 1)
    m_list = np.empty(ncoef, int)
    offset = 0
    for ii in n_range:
        m_list[offset:offset + 2 * ii + 1] = np.arange(-ii, ii + 1)
        offset += 2 * ii + 1
    return m_list, n_list


def _assoc_legendre(m, n, x):
    """P_n^m(x) for m >= 0 with Condon-Shortley phase (matches scipy.lpmv)."""
    pmm = np.ones_like(x)
    if m > 0:
        somx2 = np.sqrt(np.maximum(1.0 - x * x, 0.0))
        fact = 1.0
        for _ in range(m):
            pmm = -pmm * fact * somx2
            fact += 2.0
    if n == m:
        return pmm
    pmmp1 = x * (2 * m + 1) * pmm
    if n == m + 1:
        return pmmp1
    for nn in range(m + 2, n + 1):
        pnn = ((2 * nn - 1) * x * pmmp1 - (nn + m - 1) * pmm) / (nn - m)
        pmm, pmmp1 = pmmp1, pnn
    return pmmp1


def _sph_harm(m, n, azimuth, polar):
    """Complex Y_n^m sampled at (azimuth, polar), scipy.sph_harm convention."""
    norm = sqrt((2 * n + 1) / (4.0 * pi) * factorial(n - m) / factorial(n + m))
    P = _assoc_legendre(m, n, np.cos(polar))
    return norm * P * np.exp(1j * m * azimuth)


def real_sym_sh_basis(sh_order, theta, phi):
    """Legacy descoteaux real symmetric SH basis, shape (n_points, n_coefs)."""
    m_list, n_list = sph_harm_ind_list(sh_order)
    phi = np.reshape(phi, [-1])
    theta = np.reshape(theta, [-1])
    cols = []
    for m, n in zip(m_list, n_list):
        sh = _sph_harm(abs(int(m)), int(n), phi, theta)
        col = sh.imag if m > 0 else sh.real
        if m != 0:
            col = col * sqrt(2.0)
        cols.append(col)
    return np.stack(cols, axis=1).astype(np.float32)


# ----------------------------------------------------------------------------
# Pallas kernel: one fused GEMM + quadrature log-normalizer, 16-lane output.
# ----------------------------------------------------------------------------
def operator_kernel(h_ref, wm_ref, cb_ref, out_ref, *,
                    k_real, k_out, quad_start, precision):
    h = h_ref[...]                                                   # (TB, H)

    # Single H-deep GEMM over the lane-packed weight:
    #   lanes [0, K)                    -> W^T            (coefs)
    #   lanes [quad_start, quad_start+Q)-> W^T @ Phi^T    (quadrature exponents)
    # Bias packs [b | 0 | Phi@b + log(w) | -1e30 padding].
    y = jnp.dot(h, wm_ref[...], preferred_element_type=jnp.float32,
                precision=precision) + cb_ref[...]                   # (TB, WT)

    # Stabilized log-sum-exp over the quadrature lanes.  Coef lanes are masked
    # to -1e30; padded quadrature lanes already carry a -1e30 bias, so exp(.)
    # underflows to exactly 0 for every dead lane.
    lane = jax.lax.broadcasted_iota(jnp.int32, y.shape, dimension=1)
    s = jnp.where(lane >= quad_start, y, -1e30)
    s_max = jnp.max(s, axis=1, keepdims=True)                        # (TB, 1)
    norm = s_max + jnp.log(jnp.sum(jnp.exp(s - s_max),
                                   axis=1, keepdims=True))           # (TB, 1)

    # Narrow output: lanes 0..K-1 = coefs, lane K = packed log-normalizer.
    coefs = y[:, :k_out]                                             # (TB, K+1)
    out_lane = jax.lax.broadcasted_iota(jnp.int32, coefs.shape, dimension=1)
    out_ref[...] = jnp.where(out_lane == k_real, norm, coefs)


def _round_up(x, m):
    return ((x + m - 1) // m) * m


def operator_network_forward(h, W, b, Phi_quad, quad_weights,
                             *, tile_b=1024, use_bf16=False, precision=None):
    """h:(B,H), W:(K,H), b:(K,), Phi_quad:(Q,K), quad_weights:(Q,)
    -> (log_v_coefs:(B,K) f32, log_v_norm:(B,) f32)"""
    h = jnp.asarray(h, jnp.float32)
    W = jnp.asarray(W, jnp.float32)
    b = jnp.asarray(b, jnp.float32)
    Phi_quad = jnp.asarray(Phi_quad, jnp.float32)
    quad_weights = jnp.asarray(quad_weights, jnp.float32)

    B, H = h.shape
    K = W.shape[0]
    Q = Phi_quad.shape[0]

    K_OUT = K + 1                      # coef lanes + 1 packed-normalizer lane
    QUAD_START = K_OUT
    W_TOT = _round_up(QUAD_START + Q, 128)

    # --- host/XLA-side parameter prep (one-time; weights are tiny) ----------
    # Fold the second GEMM's K-deep contraction and the quadrature weights:
    #   s = (h@W.T + b) @ Phi.T + log(w) = h @ (W.T@Phi.T) + (Phi@b + log(w))
    # (assumes quad_weights > 0, as in the module's uniform 4*pi/Q scheme).
    M = W.T @ Phi_quad.T                                             # (H, Q)
    c = Phi_quad @ b + jnp.log(quad_weights)                         # (Q,)

    wm = jnp.zeros((H, W_TOT), jnp.float32)
    wm = wm.at[:, :K].set(W.T)
    wm = wm.at[:, QUAD_START:QUAD_START + Q].set(M)

    cb = jnp.full((1, W_TOT), -1e30, jnp.float32)
    cb = cb.at[0, :K].set(b)
    cb = cb.at[0, K].set(0.0)          # spare lane; overwritten with norm in-kernel
    cb = cb.at[0, QUAD_START:QUAD_START + Q].set(c)

    mat_dtype = jnp.bfloat16 if use_bf16 else jnp.float32
    # NB: this cast is itself a wrapper-side pass over h; the real bf16 win
    # requires the producer (summary network) to emit bf16 directly.
    h_in = h.astype(mat_dtype)
    wm_in = wm.astype(mat_dtype)

    # --- batch tiling --------------------------------------------------------
    # Large tiles amortize per-grid-step overhead, but cap so grid >= 2 steps
    # (keeps both v7x TensorCores busy).  No wrapper-side padding of h: Pallas
    # masks the final partial block.
    tb = max(8, min(int(tile_b), _round_up(pl.cdiv(B, 2), 8)))
    tb = _round_up(tb, 8)
    grid = (pl.cdiv(B, tb),)

    itemsize = 2 if use_bf16 else 4
    tile_bytes = (tb * H * itemsize            # h tile
                  + H * W_TOT * itemsize       # fused weight
                  + W_TOT * 4                  # fused bias
                  + tb * K_OUT * 4)            # output tile
    # 32 MiB cap keeps v7x (64 MiB VMEM/TC) comfortable; fine on v5e/v6e too.
    vmem_limit = int(min(max(4 * tile_bytes, 8 << 20), 32 << 20))

    out = pl.pallas_call(
        functools.partial(operator_kernel, k_real=K, k_out=K_OUT,
                          quad_start=QUAD_START, precision=precision),
        out_shape=jax.ShapeDtypeStruct((B, K_OUT), jnp.float32),
        grid_spec=pltpu.PrefetchScalarGridSpec(
            num_scalar_prefetch=0,
            grid=grid,
            in_specs=[
                pl.BlockSpec((tb, H), lambda i: (i, 0)),        # h tile
                pl.BlockSpec((H, W_TOT), lambda i: (0, 0)),     # [W^T | W^T Phi^T]
                pl.BlockSpec((1, W_TOT), lambda i: (0, 0)),     # [b | Phi@b+log w]
            ],
            out_specs=pl.BlockSpec((tb, K_OUT), lambda i: (i, 0)),
        ),
        compiler_params=pltpu.CompilerParams(
            dimension_semantics=("parallel",),
            vmem_limit_bytes=vmem_limit),
    )(h_in, wm_in, cb)

    log_v_coefs = out[:, :K]
    log_v_norm = out[:, K]
    return log_v_coefs, log_v_norm


# ----------------------------------------------------------------------------
if __name__ == "__main__":
    key = jax.random.PRNGKey(0)
    k1, k2, k3, k4 = jax.random.split(key, 4)

    # Sizes implied by the module:
    #   summary_network.out_channels * summary_network.nvertices = hidden_features
    #   FuncSpace.K = number of SH coefficients for sh_order
    B, C_out, V = 8, 4, 32
    hidden_features = C_out * V               # 128
    sh_order = 4
    K = (sh_order + 2) * (sh_order + 1) // 2  # 15
    Q = 64                                    # quadrature points

    # TODO(synk): the spherical-CNN summary network (_hidden_net) is an external
    # constructor argument with unknown architecture; the kernel consumes its
    # 'model_out_equi' output directly.
    model_out_equi = jax.random.normal(k1, (B, C_out, V), dtype=jnp.float32)
    h = model_out_equi.reshape(B, hidden_features)  # == torch .view(-1, hidden)

    # Deterministic final-layer parameters (nn.Linear(hidden_features, K)).
    W = 0.05 * jax.random.normal(k2, (K, hidden_features), dtype=jnp.float32)
    b = 0.05 * jax.random.normal(k3, (K,), dtype=jnp.float32)

    # Deterministic quadrature grid on the unit sphere + uniform weights.
    quad_pts = np.asarray(jax.random.normal(k4, (Q, 3), dtype=jnp.float32))
    quad_pts = quad_pts / np.linalg.norm(quad_pts, axis=1, keepdims=True)
    quad_sph = cart2sphere(quad_pts)
    theta_q, phi_q = quad_sph[:, 0], quad_sph[:, 1]
    # NB: the module passes phi_q for BOTH angle args; reproduced faithfully.
    Phi_quad = real_sym_sh_basis(sh_order, phi_q, phi_q)          # (Q, K)
    quad_weights = np.full((Q,), 4.0 * np.pi / Q, dtype=np.float32)

    log_v_coefs, log_v_norm = operator_network_forward(
        h, W, b, jnp.asarray(Phi_quad), jnp.asarray(quad_weights))
    jax.block_until_ready((log_v_coefs, log_v_norm))

    # Plain-JAX reference (same math as the torch forward).
    ref_coefs = h @ W.T + b
    ref_norm = jnp.log(jnp.sum(jnp.exp(ref_coefs @ jnp.asarray(Phi_quad).T)
                               * jnp.asarray(quad_weights), axis=1))
    assert np.allclose(np.asarray(log_v_coefs), np.asarray(ref_coefs),
                       rtol=1e-4, atol=1e-4)
    assert np.allclose(np.asarray(log_v_norm), np.asarray(ref_norm),
                       rtol=1e-4, atol=1e-4)
    assert log_v_coefs.shape == (B, K) and log_v_norm.shape == (B,)

    print("KERNEL_OK")
</pallas_src>

<mosaic_0001>
module attributes {stable_mosaic.version = 11 : i64} {
  func.func @operator_kernel(%arg0: i32, %arg1: memref<8x128xf32, #tpu.memory_space<vmem>>, %arg2: memref<128x128xf32, #tpu.memory_space<vmem>>, %arg3: memref<1x128xf32, #tpu.memory_space<vmem>>, %arg4: memref<8x16xf32, #tpu.memory_space<vmem>>) attributes {dimension_semantics = [#tpu.dimension_semantics<parallel>], iteration_bounds = array<i64: 1>, scalar_prefetch = 0 : i64, scratch_operands = 0 : i64, tpu.core_type = #tpu.core_type<tc>, window_params = [{transform_indices = @transform_0, window_bounds = array<i64: 8, 128>}, {pipeline_mode = #tpu.pipeline_mode<synchronous>, transform_indices = @transform_1, window_bounds = array<i64: 128, 128>}, {pipeline_mode = #tpu.pipeline_mode<synchronous>, transform_indices = @transform_2, window_bounds = array<i64: 1, 128>}, {transform_indices = @transform_3, window_bounds = array<i64: 8, 16>}]} {
    %c0 = arith.constant 0 : index
    %c0_0 = arith.constant 0 : index
    %0 = vector.load %arg1[%c0, %c0_0] : memref<8x128xf32, #tpu.memory_space<vmem>>, vector<8x128xf32>
    %c0_1 = arith.constant 0 : index
    %c0_2 = arith.constant 0 : index
    %1 = vector.load %arg2[%c0_1, %c0_2] : memref<128x128xf32, #tpu.memory_space<vmem>>, vector<128x128xf32>
    %cst = arith.constant dense<0.000000e+00> : vector<8x128xf32>
    %2 = tpu.matmul %0, %1, %cst {dimension_numbers = #tpu.dot_dimension_numbers<[1], [0], [0], [1], [0, 0, 1, 1], [], []>} : vector<8x128xf32>, vector<128x128xf32>, vector<8x128xf32> -> vector<8x128xf32>
    %c0_3 = arith.constant 0 : index
    %c0_4 = arith.constant 0 : index
    %3 = vector.load %arg3[%c0_3, %c0_4] : memref<1x128xf32, #tpu.memory_space<vmem>>, vector<1x128xf32>
    %4 = vector.broadcast %3 : vector<1x128xf32> to vector<8x128xf32>
    %5 = arith.addf %2, %4 : vector<8x128xf32>
    %6 = tpu.iota {dimensions = array<i32: 1>} : vector<8x128xi32>
    %c16_i32 = arith.constant 16 : i32
    %7 = vector.broadcast %c16_i32 : i32 to vector<8x128xi32>
    %8 = arith.cmpi sge, %6, %7 : vector<8x128xi32>
    %cst_5 = arith.constant -1.000000e+30 : f32
    %9 = vector.broadcast %cst_5 : f32 to vector<8x128xf32>
    %10 = arith.select %8, %5, %9 : vector<8x128xi1>, vector<8x128xf32>
    %cst_6 = arith.constant dense<0xFF800000> : vector<8xf32>
    %11 = vector.multi_reduction <maximumf>, %10, %cst_6 [1] : vector<8x128xf32> to vector<8xf32>
    %12 = vector.shape_cast %11 : vector<8xf32> to vector<8x1xf32>
    %13 = vector.broadcast %12 : vector<8x1xf32> to vector<8x128xf32>
    %14 = arith.subf %10, %13 : vector<8x128xf32>
    %15 = math.exp %14 : vector<8x128xf32>
    %cst_7 = arith.constant dense<0.000000e+00> : vector<8xf32>
    %16 = vector.multi_reduction <add>, %15, %cst_7 [1] : vector<8x128xf32> to vector<8xf32>
    %17 = vector.shape_cast %16 : vector<8xf32> to vector<8x1xf32>
    %18 = math.log %17 : vector<8x1xf32>
    %19 = arith.addf %12, %18 : vector<8x1xf32>
    %20 = vector.extract_strided_slice %5 {offsets = [0, 0], sizes = [8, 16], strides = [1, 1]} : vector<8x128xf32> to vector<8x16xf32>
    %21 = tpu.iota {dimensions = array<i32: 1>} : vector<8x16xi32>
    %c15_i32 = arith.constant 15 : i32
    %22 = vector.broadcast %c15_i32 : i32 to vector<8x16xi32>
    %23 = arith.cmpi eq, %21, %22 : vector<8x16xi32>
    %24 = vector.shape_cast %19 : vector<8x1xf32> to vector<8x1xf32>
    %25 = vector.broadcast %24 : vector<8x1xf32> to vector<8x16xf32>
    %26 = arith.select %23, %25, %20 : vector<8x16xi1>, vector<8x16xf32>
    %c0_8 = arith.constant 0 : index
    %c0_9 = arith.constant 0 : index
    %27 = vector.load %arg4[%c0_8, %c0_9] : memref<8x16xf32, #tpu.memory_space<vmem>>, vector<8x16xf32>
    tpu.vector_store %arg4[%c0_8, %c0_9], %26 {strides = array<i32>} : memref<8x16xf32, #tpu.memory_space<vmem>>, vector<8x16xf32>,
    return
  }
  func.func @transform_0(%arg0: i32) -> (i32, i32) {
    %c0_i32 = arith.constant 0 : i32
    %c0_i32_0 = arith.constant 0 : i32
    return %arg0, %c0_i32 : i32, i32
  }
  func.func @transform_1(%arg0: i32) -> (i32, i32) {
    %c0_i32 = arith.constant 0 : i32
    %c0_i32_0 = arith.constant 0 : i32
    %c0_i32_1 = arith.constant 0 : i32
    return %c0_i32, %c0_i32_0 : i32, i32
  }
  func.func @transform_2(%arg0: i32) -> (i32, i32) {
    %c0_i32 = arith.constant 0 : i32
    %c0_i32_0 = arith.constant 0 : i32
    %c0_i32_1 = arith.constant 0 : i32
    return %c0_i32, %c0_i32_0 : i32, i32
  }
  func.func @transform_3(%arg0: i32) -> (i32, i32) {
    %c0_i32 = arith.constant 0 : i32
    %c0_i32_0 = arith.constant 0 : i32
    return %arg0, %c0_i32 : i32, i32
  }
}

</mosaic_0001>

<bundles_post_ra>
// kernel: tpu_custom_call.1
= control target key start
LH: loop header
LB: loop body
LE: loop exit
PB: predicated region body
PF: predicated region fallthrough
CT: control target
= control target key end

     0   :  { %8 = vsyncpa [#allocation3], 0  ;;  %s247_s0 = inlined_call_operand.hbm [shape: f32[8,128], index: 0, kind: input, shape index: {}]   ;;  %s248_s1 = inlined_call_operand.hbm [shape: f32[128,128], index: 1, kind: input, shape index: {}]   ;;  %s249_s2 = inlined_call_operand.vmem [shape: f32[1,128], index: 2, kind: input, shape index: {}]   ;;  %s250_s3 = inlined_call_operand.hbm [shape: f32[8,16], index: 3, kind: output, shape index: {}]  }
   0x1   :  { %9 = vsyncpa [#allocation6], 0 }
   0x2   :  { %10 = vsyncpa [#allocation4], 0  ;;  %s16_s14 = sshll.u32 %s247_s0, 4  ;;  %s210_s15 = smov [#allocation2]   ;;  %s17_s14 = int_to_ptr.hbm [resolvable:$true] %s16_s14 }
   0x3   :  { %s18_s16 = sshll.u32 %s210_s15, 4  ;;  %s26_s19 = sshll.u32 %s248_s1, 4  ;;  %s19_s16 = int_to_ptr.vmem [resolvable:$true] %s18_s16  ;;  %s27_s19 = int_to_ptr.hbm [resolvable:$true] %s26_s19 }
   0x4   :  { %21 = dma.hbm_to_vmem [thread:$0]  %s17_s14, 128, %s19_s16, [#allocation3]  }
   0x5   :  { %s211_s20 = smov [#allocation5]   ;;  %s212_s22 = smov 128  }
   0x6   :  { %s28_s21 = sshll.u32 %s211_s20, 4  ;;  %s213_s23 = smov 8   ;;  %s29_s21 = int_to_ptr.vmem [resolvable:$true] %s28_s21 }
   0x7   :  { %34 = dma.hbm_to_vmem [thread:$0]  %s27_s19, 2048, %s29_s21, [#allocation6], %s212_s22, %s212_s22, %s213_s23  }
   0x8   :  { %204 = dma.done.wait [#allocation3], 128  }
   0x9   :  { %205 = vsyncadd [#allocation3], 4294967168 }
   0xa   :  { %206 = dma.done.wait [#allocation6], 2048  }
   0xb   :  { %207 = vsyncadd [#allocation6], 4294965248  ;;  %v61_v0 = vld [vmem:[#allocation5 + $0x78] sm:$0xff]  ;;  %v60_v1 = vld [vmem:[#allocation5 + $0x70] sm:$0xff]  ;;  %v86_v17 = vlaneseq  ;;  %s214_s24 = smov [#allocation7]   ;;  %vm102_vm2 = vcmask 130048  }
   0xc   :  { %66 = vmatpush.msra.mxu0 %v61_v0  ;;  %v59_v2 = vld [vmem:[#allocation5 + $0x68] sm:$0xff]  ;;  %v58_v3 = vld [vmem:[#allocation5 + $0x60] sm:$0xff]  ;;  %v57_v4 = vld [vmem:[#allocation5 + $0x58] sm:$0xff]  ;;  %s109_s25 = sshll.u32 %s214_s24, 4  ;;  %s110_s25 = int_to_ptr.vmem [resolvable:$true] %s109_s25 }
   0xd   :  { %v56_v5 = vld [vmem:[#allocation5 + $0x50] sm:$0xff]  ;;  %v55_v6 = vld [vmem:[#allocation5 + $0x48] sm:$0xff]  ;;  %v54_v7 = vld [vmem:[#allocation5 + $0x40] sm:$0xff]  ;;  %v87_v18 = vand.u32 127, %v86_v17 }
   0xe   :  { %67 = vmatpush.msra.mxu0 %v60_v1  ;;  %v53_v8 = vld [vmem:[#allocation5 + $0x38] sm:$0xff]  ;;  %v52_v9 = vld [vmem:[#allocation5 + $0x30] sm:$0xff]  ;;  %v51_v10 = vld [vmem:[#allocation5 + $0x28] sm:$0xff] }
   0xf   :  { %v50_v11 = vld [vmem:[#allocation5 + $0x20] sm:$0xff]  ;;  %v49_v12 = vld [vmem:[#allocation5 + $0x18] sm:$0xff]  ;;  %v48_v13 = vld [vmem:[#allocation5 + $0x10] sm:$0xff]  ;;  %vm88_vm0 = vcmp.ge.s32.totalorder %v87_v18, 16  ;;  %vm100_vm1 = vcmp.eq.s32.totalorder %v87_v18, 15 }
  0x10   :  { %68 = vmatpush.msra.mxu0 %v59_v2  ;;  %v47_v14 = vld [vmem:[#allocation5 + $0x8] sm:$0xff]  ;;  %v46_v15 = vld [vmem:[#allocation5] sm:$0xff]  ;;  %v45_v16 = vld [vmem:[#allocation2] sm:$0xff] }
  0x11   :  { %v127_v19 = vld [vmem:[%s249_s2] ss:$0 sm:$0xff]  ;;  %s111_s2 = sshll.u32 %s250_s3, 4  ;;  %s112_s2 = int_to_ptr.hbm [resolvable:$true] %s111_s2 }
  0x12   :  { %69 = vmatpush.msra.mxu0 %v58_v3 }
  0x14   :  { %70 = vmatpush.msra.mxu0 %v57_v4 }
  0x16   :  { %71 = vmatpush.msra.mxu0 %v56_v5 }
  0x18   :  { %72 = vmatpush.msra.mxu0 %v55_v6 }
  0x1a   :  { %73 = vmatpush.msra.mxu0 %v54_v7 }
  0x1c   :  { %74 = vmatpush.msra.mxu0 %v53_v8 }
  0x1e   :  { %75 = vmatpush.msra.mxu0 %v52_v9 }
  0x20   :  { %76 = vmatpush.msra.mxu0 %v51_v10 }
  0x22   :  { %77 = vmatpush.msra.mxu0 %v50_v11 }
  0x24   :  { %78 = vmatpush.msra.mxu0 %v49_v12 }
  0x26   :  { %79 = vmatpush.msra.mxu0 %v48_v13 }
  0x28   :  { %80 = vmatpush.msra.mxu0 %v47_v14 }
  0x2a   :  { %81 = vmatpush.msra.mxu0 %v46_v15 }
  0x2b   :  { %82 = vmatmul.f32.vlgmr.msra.gmra.mxu0 %v45_v16 }
  0xa8   :  { %v83_v20 = vpop.f32.mrf.mxu0 }
  0xa9   :  { %v84_v21 = vadd.f32 %v127_v19, %v83_v20 }
  0xab   :  { %v89_v22 = vsel %vm88_vm0, %v84_v21, -1e+30 }
  0xac   :  { %90 = vmax.xlane.f32.xlu0 %v89_v22 }
 0x11f   :  { %v91_v23 = vpop.xlane.xlu0 %90 }
 0x120   :  { %v92_v24 = vsub.f32 %v89_v22, %v91_v23 }
 0x122   :  { %v93_v25 = vmul.f32 1.442695, %v92_v24 }
 0x124   :  { %128 = vpow2.f32 %v93_v25 }
 0x12a   :  { %v129_v26 = vpop.eup %128 }
 0x12b   :  { %95 = vadd.xlane.f32.xlu0 %v129_v26 }
 0x19e   :  { %v96_v27 = vpop.xlane.xlu0 %95 }
 0x19f   :  { %130 = vlog2.f32 %v96_v27 }
 0x1a5   :  { %v131_v28 = vpop.eup %130 }
 0x1a6   :  { %v98_v29 = vmul.f32 0.6931472, %v131_v28 }
 0x1a8   :  { %v99_v30 = vadd.f32 %v98_v29, %v91_v23 }
 0x1aa   :  { %v101_v31 = vsel %vm100_vm1, %v99_v30, %v84_v21 }
 0x1ab   :  { %103 = vst.msk [vmem:[#allocation7] sm:$0xff] %vm102_vm2, %v101_v31 }
 0x1ac   :  { %114 = dma.vmem_to_hbm [thread:$0]  %s110_s25, 128, %s112_s2, [#allocation4]  }
 0x1ad   :  { %208 = dma.done.wait [#allocation4], 128  }
 0x1ae   :  { %209 = vsyncadd [#allocation4], 4294967168 }
 0x1af   :  { %119 = vsyncpa [#allocation3], 1 }
 0x1b0   :  { %120 = vsyncpa [#allocation6], 1 }
 0x1b1   :  { %121 = vsyncpa [#allocation4], 1 }

</bundles_post_ra>
